<compile_context>
chip_gen: v7x
topology: tpu7x:2x2x1
jax: 0.10.0
libtpu: 0.0.40
codegen_flags: <defaults>
</compile_context>

<pallas_src>
import math

import jax
import jax.numpy as jnp
from jax import lax
from jax.experimental import pallas as pl
from jax.experimental.pallas import tpu as pltpu


def _round_up(x, m):
    return (x + m - 1) // m * m


def _make_fused_kernel(dilations, K, C_MAX, L, L_LANE, PAD_OFF, compute_dtype):
    """Builds the fused multi-layer kernel body (all shapes static)."""
    NL = len(dilations)
    needs_mask = (L != L_LANE)

    def kernel(x_ref, w_ref, b_ref, o_ref, buf_a, buf_b):
        # x_ref:  (1, C_MAX, L)           channel-padded input row
        # w_ref:  (NL, C_MAX, K*C_MAX)    im2col-flattened, zero-padded weights
        # b_ref:  (NL, C_MAX, 1)          zero-padded biases
        # o_ref:  (1, C_MAX, L_LANE)      lane-dense output tile
        # buf_a/buf_b: (C_MAX, L_TOT) f32 VMEM ping-pong activation buffers (halo = zeros)
        buf_a[...] = jnp.zeros_like(buf_a)
        buf_b[...] = jnp.zeros_like(buf_b)
        buf_a[:, PAD_OFF:PAD_OFF + L] = x_ref[0].astype(buf_a.dtype)

        if needs_mask:
            col = lax.broadcasted_iota(jnp.int32, (C_MAX, L_LANE), 1)
            valid = col < L

        bufs = (buf_a, buf_b)
        for l in range(NL):                       # static unrolled loop over layers
            dil = dilations[l]
            pad = (K - 1) * dil // 2
            src = bufs[l % 2]
            # im2col slab (K*C_MAX, L_LANE); row order = k-major / channel-minor,
            # matching the flattened weight layout -> single MXU push per layer.
            x_slab = jnp.concatenate(
                [src[:, PAD_OFF - pad + k * dil: PAD_OFF - pad + k * dil + L_LANE]
                 for k in range(K)],
                axis=0,
            )
            w_l = w_ref[l]                        # (C_MAX, K*C_MAX)
            b_l = b_ref[l]                        # (C_MAX, 1)
            y = jnp.dot(w_l.astype(compute_dtype), x_slab.astype(compute_dtype),
                        preferred_element_type=jnp.float32)
            y = jnp.maximum(y + b_l, 0.0)         # fused bias + ReLU (f32 epilogue)
            # TODO(synk): training-mode Dropout (random mask + 1/(1-p) scale) not implemented.
            if needs_mask:
                # keep zero-padding semantics for the next layer's halo reads
                y = jnp.where(valid, y, 0.0)
            if l == NL - 1:
                o_ref[0] = y.astype(o_ref.dtype)
            else:
                bufs[(l + 1) % 2][:, PAD_OFF:PAD_OFF + L_LANE] = y

    return kernel


def temporal_conv_net_fused(x, params, *, compute_dtype=jnp.float32):
    """Fused TemporalConvNet forward pass (eval mode: Dropout == identity).

    x:      (N, C_in, L) float32
    params: list of (w (C_out, C_in, K), b (C_out,), dilation)
    compute_dtype: dtype for the MXU matmul inputs (jnp.bfloat16 for extra speed on
                   v6e/v7x; f32 accumulation is always used).
    """
    N, C_in, L = x.shape
    K = params[0][0].shape[-1]
    NL = len(params)
    dilations = tuple(int(d) for (_, _, d) in params)
    # Odd K keeps per-layer length constant (L_out == L), like the K=3 default.
    assert all(((K - 1) * d) % 2 == 0 for d in dilations), "even kernel_size unsupported"

    channel_dims = [C_in] + [int(w.shape[0]) for (w, _, _) in params]
    C_MAX = max(_round_up(c, 8) for c in channel_dims)       # sublane-aligned channels
    C_out_last = int(params[-1][0].shape[0])

    L_LANE = _round_up(L, 128)                                # lane-dense output tile
    PAD_OFF = max((K - 1) * d // 2 for d in dilations)        # worst-case halo
    L_TOT = _round_up(L_LANE + 2 * PAD_OFF, 128)              # scratch lane width

    # ---- one-time packing (tiny; done once in HBM, not per layer) -------------
    x_p = jnp.pad(x, ((0, 0), (0, C_MAX - C_in), (0, 0)))     # channel pad only
    w_list, b_list = [], []
    for (w, b, _) in params:
        co, ci, _ = w.shape
        wt = jnp.transpose(w, (0, 2, 1))                      # (C_out, K, C_in)
        wt = jnp.pad(wt, ((0, C_MAX - co), (0, 0), (0, C_MAX - ci)))
        w_list.append(wt.reshape(C_MAX, K * C_MAX))
        b_list.append(jnp.pad(b, (0, C_MAX - co)).reshape(C_MAX, 1))
    w_all = jnp.stack(w_list).astype(x.dtype)                 # (NL, C_MAX, K*C_MAX)
    b_all = jnp.stack(b_list).astype(jnp.float32)             # (NL, C_MAX, 1)

    kernel = _make_fused_kernel(dilations, K, C_MAX, L, L_LANE, PAD_OFF, compute_dtype)

    # Explicit VMEM budget (double-buffered blocks + weights + ping-pong scratch + im2col temp).
    itemsize = 4
    vmem_needed = itemsize * (
        2 * C_MAX * L
        + 2 * C_MAX * L_LANE
        + 2 * NL * C_MAX * (K * C_MAX + 1)
        + 2 * C_MAX * L_TOT
        + K * C_MAX * L_LANE
    )
    vmem_limit = int(min(64 * 2 ** 20, max(16 * 2 ** 20, 2 * vmem_needed + (1 << 20))))
    # TODO(synk): for very long sequences add an L-tile grid axis with inter-tile halos
    # instead of holding the whole (C_MAX, L_TOT) row in VMEM.

    out = pl.pallas_call(
        kernel,
        out_shape=jax.ShapeDtypeStruct((N, C_MAX, L_LANE), x.dtype),
        grid=(N,),
        in_specs=[
            pl.BlockSpec((1, C_MAX, L), lambda n: (n, 0, 0)),
            pl.BlockSpec((NL, C_MAX, K * C_MAX), lambda n: (0, 0, 0)),
            pl.BlockSpec((NL, C_MAX, 1), lambda n: (0, 0, 0)),
        ],
        out_specs=pl.BlockSpec((1, C_MAX, L_LANE), lambda n: (n, 0, 0)),
        scratch_shapes=[
            pltpu.VMEM((C_MAX, L_TOT), jnp.float32),
            pltpu.VMEM((C_MAX, L_TOT), jnp.float32),
        ],
        compiler_params=pltpu.CompilerParams(
            dimension_semantics=("parallel",),
            vmem_limit_bytes=vmem_limit,
        ),
    )(x_p, w_all, b_all)

    if C_MAX != C_out_last or L_LANE != L:
        out = out[:, :C_out_last, :L]
    return out


def init_tcn_params(key, input_size, num_channels, kernel_size=3):
    """Deterministic PyTorch-style uniform init for each Conv1d layer."""
    params = []
    for i, out_channels in enumerate(num_channels):
        in_channels = input_size if i == 0 else num_channels[i - 1]
        dilation = 2 ** i
        key, kw, kb = jax.random.split(key, 3)
        bound = 1.0 / math.sqrt(in_channels * kernel_size)
        w = jax.random.uniform(kw, (out_channels, in_channels, kernel_size),
                               jnp.float32, minval=-bound, maxval=bound)
        b = jax.random.uniform(kb, (out_channels,), jnp.float32,
                               minval=-bound, maxval=bound)
        params.append((w, b, dilation))
    return params


def temporal_conv_net_ref(x, params):
    """Pure-JAX reference (lax conv) for correctness checking."""
    out = x
    for (w, b, dilation) in params:
        K = w.shape[-1]
        pad = (K - 1) * dilation // 2
        y = lax.conv_general_dilated(
            out, w, window_strides=(1,), padding=[(pad, pad)],
            rhs_dilation=(dilation,),
            dimension_numbers=("NCW", "OIW", "NCW"))
        out = jnp.maximum(y + b[None, :, None], 0.0)
    return out


if __name__ == "__main__":
    key = jax.random.PRNGKey(0)
    k_x, k_p = jax.random.split(key)

    # TemporalConvNet(input_size=4, num_channels=[8, 8, 8], kernel_size=3)
    batch, input_size, seq_len = 2, 4, 16
    num_channels = [8, 8, 8]
    kernel_size = 3

    x = jax.random.normal(k_x, (batch, input_size, seq_len), jnp.float32)
    params = init_tcn_params(k_p, input_size, num_channels, kernel_size)

    out = temporal_conv_net_fused(x, params)
    out = jax.block_until_ready(out)

    ref = temporal_conv_net_ref(x, params)
    assert out.shape == (batch, num_channels[-1], seq_len), out.shape
    assert jnp.allclose(out, ref, atol=1e-4, rtol=1e-4), "mismatch vs JAX reference"

    print("KERNEL_OK")
</pallas_src>

<mosaic_0001>
module attributes {stable_mosaic.version = 11 : i64} {
  func.func @kernel(%arg0: i32, %arg1: memref<1x8x16xf32, #tpu.memory_space<vmem>>, %arg2: memref<3x8x24xf32, #tpu.memory_space<vmem>>, %arg3: memref<3x8x1xf32, #tpu.memory_space<vmem>>, %arg4: memref<1x8x128xf32, #tpu.memory_space<vmem>>, %arg5: memref<8x256xf32, #tpu.memory_space<vmem>>, %arg6: memref<8x256xf32, #tpu.memory_space<vmem>>) attributes {dimension_semantics = [#tpu.dimension_semantics<parallel>], iteration_bounds = array<i64: 2>, scalar_prefetch = 0 : i64, scratch_operands = 2 : i64, tpu.core_type = #tpu.core_type<tc>, window_params = [{transform_indices = @transform_0, window_bounds = array<i64: 1, 8, 16>}, {pipeline_mode = #tpu.pipeline_mode<synchronous>, transform_indices = @transform_1, window_bounds = array<i64: 3, 8, 24>}, {pipeline_mode = #tpu.pipeline_mode<synchronous>, transform_indices = @transform_2, window_bounds = array<i64: 3, 8, 1>}, {transform_indices = @transform_3, window_bounds = array<i64: 1, 8, 128>}]} {
    %cst = arith.constant 0.000000e+00 : f32
    %0 = vector.broadcast %cst : f32 to vector<8x256xf32>
    %c0 = arith.constant 0 : index
    %c0_0 = arith.constant 0 : index
    %1 = vector.load %arg5[%c0, %c0_0] : memref<8x256xf32, #tpu.memory_space<vmem>>, vector<8x256xf32>
    tpu.vector_store %arg5[%c0, %c0_0], %0 {strides = array<i32>} : memref<8x256xf32, #tpu.memory_space<vmem>>, vector<8x256xf32>,
    %cst_1 = arith.constant 0.000000e+00 : f32
    %2 = vector.broadcast %cst_1 : f32 to vector<8x256xf32>
    %c0_2 = arith.constant 0 : index
    %c0_3 = arith.constant 0 : index
    %3 = vector.load %arg6[%c0_2, %c0_3] : memref<8x256xf32, #tpu.memory_space<vmem>>, vector<8x256xf32>
    tpu.vector_store %arg6[%c0_2, %c0_3], %2 {strides = array<i32>} : memref<8x256xf32, #tpu.memory_space<vmem>>, vector<8x256xf32>,
    %c0_4 = arith.constant 0 : index
    %c0_5 = arith.constant 0 : index
    %c0_6 = arith.constant 0 : index
    %4 = vector.load %arg1[%c0_4, %c0_5, %c0_6] : memref<1x8x16xf32, #tpu.memory_space<vmem>>, vector<1x8x16xf32>
    %5 = vector.shape_cast %4 : vector<1x8x16xf32> to vector<8x16xf32>
    %c0_7 = arith.constant 0 : index
    %c4 = arith.constant 4 : index
    %6 = vector.load %arg5[%c0_7, %c4] : memref<8x256xf32, #tpu.memory_space<vmem>>, vector<8x16xf32>
    tpu.vector_store %arg5[%c0_7, %c4], %5 {strides = array<i32>} : memref<8x256xf32, #tpu.memory_space<vmem>>, vector<8x16xf32>,
    %7 = tpu.iota {dimensions = array<i32: 1>} : vector<8x128xi32>
    %c16_i32 = arith.constant 16 : i32
    %8 = vector.broadcast %c16_i32 : i32 to vector<8x128xi32>
    %9 = arith.cmpi slt, %7, %8 : vector<8x128xi32>
    %c0_8 = arith.constant 0 : index
    %c3 = arith.constant 3 : index
    %10 = vector.load %arg5[%c0_8, %c3] : memref<8x256xf32, #tpu.memory_space<vmem>>, vector<8x128xf32>
    %c0_9 = arith.constant 0 : index
    %c4_10 = arith.constant 4 : index
    %11 = vector.load %arg5[%c0_9, %c4_10] : memref<8x256xf32, #tpu.memory_space<vmem>>, vector<8x128xf32>
    %c0_11 = arith.constant 0 : index
    %c5 = arith.constant 5 : index
    %12 = vector.load %arg5[%c0_11, %c5] : memref<8x256xf32, #tpu.memory_space<vmem>>, vector<8x128xf32>
    %13 = tpu.concatenate %10, %11, %12 in 0 : vector<8x128xf32>, vector<8x128xf32>, vector<8x128xf32> -> vector<24x128xf32>
    %c0_12 = arith.constant 0 : index
    %c0_13 = arith.constant 0 : index
    %c0_14 = arith.constant 0 : index
    %14 = vector.load %arg2[%c0_12, %c0_13, %c0_14] : memref<3x8x24xf32, #tpu.memory_space<vmem>>, vector<1x8x24xf32>
    %15 = vector.shape_cast %14 : vector<1x8x24xf32> to vector<8x24xf32>
    %c0_15 = arith.constant 0 : index
    %c0_16 = arith.constant 0 : index
    %c0_17 = arith.constant 0 : index
    %16 = vector.load %arg3[%c0_15, %c0_16, %c0_17] : memref<3x8x1xf32, #tpu.memory_space<vmem>>, vector<1x8x1xf32>
    %17 = vector.shape_cast %16 : vector<1x8x1xf32> to vector<8x1xf32>
    %cst_18 = arith.constant dense<0.000000e+00> : vector<8x128xf32>
    %18 = tpu.matmul %15, %13, %cst_18 {dimension_numbers = #tpu.dot_dimension_numbers<[1], [0], [0], [1], [0, 0, 1, 1], [], []>} : vector<8x24xf32>, vector<24x128xf32>, vector<8x128xf32> -> vector<8x128xf32>
    %19 = vector.broadcast %17 : vector<8x1xf32> to vector<8x128xf32>
    %20 = arith.addf %18, %19 : vector<8x128xf32>
    %cst_19 = arith.constant 0.000000e+00 : f32
    %21 = vector.broadcast %cst_19 : f32 to vector<8x128xf32>
    %22 = arith.maximumf %20, %21 : vector<8x128xf32>
    %cst_20 = arith.constant 0.000000e+00 : f32
    %23 = vector.broadcast %cst_20 : f32 to vector<8x128xf32>
    %24 = arith.select %9, %22, %23 : vector<8x128xi1>, vector<8x128xf32>
    %c0_21 = arith.constant 0 : index
    %c4_22 = arith.constant 4 : index
    %25 = vector.load %arg6[%c0_21, %c4_22] : memref<8x256xf32, #tpu.memory_space<vmem>>, vector<8x128xf32>
    tpu.vector_store %arg6[%c0_21, %c4_22], %24 {strides = array<i32>} : memref<8x256xf32, #tpu.memory_space<vmem>>, vector<8x128xf32>,
    %c0_23 = arith.constant 0 : index
    %c2 = arith.constant 2 : index
    %26 = vector.load %arg6[%c0_23, %c2] : memref<8x256xf32, #tpu.memory_space<vmem>>, vector<8x128xf32>
    %c0_24 = arith.constant 0 : index
    %c4_25 = arith.constant 4 : index
    %27 = vector.load %arg6[%c0_24, %c4_25] : memref<8x256xf32, #tpu.memory_space<vmem>>, vector<8x128xf32>
    %c0_26 = arith.constant 0 : index
    %c6 = arith.constant 6 : index
    %28 = vector.load %arg6[%c0_26, %c6] : memref<8x256xf32, #tpu.memory_space<vmem>>, vector<8x128xf32>
    %29 = tpu.concatenate %26, %27, %28 in 0 : vector<8x128xf32>, vector<8x128xf32>, vector<8x128xf32> -> vector<24x128xf32>
    %c1 = arith.constant 1 : index
    %c0_27 = arith.constant 0 : index
    %c0_28 = arith.constant 0 : index
    %30 = vector.load %arg2[%c1, %c0_27, %c0_28] : memref<3x8x24xf32, #tpu.memory_space<vmem>>, vector<1x8x24xf32>
    %31 = vector.shape_cast %30 : vector<1x8x24xf32> to vector<8x24xf32>
    %c1_29 = arith.constant 1 : index
    %c0_30 = arith.constant 0 : index
    %c0_31 = arith.constant 0 : index
    %32 = vector.load %arg3[%c1_29, %c0_30, %c0_31] : memref<3x8x1xf32, #tpu.memory_space<vmem>>, vector<1x8x1xf32>
    %33 = vector.shape_cast %32 : vector<1x8x1xf32> to vector<8x1xf32>
    %cst_32 = arith.constant dense<0.000000e+00> : vector<8x128xf32>
    %34 = tpu.matmul %31, %29, %cst_32 {dimension_numbers = #tpu.dot_dimension_numbers<[1], [0], [0], [1], [0, 0, 1, 1], [], []>} : vector<8x24xf32>, vector<24x128xf32>, vector<8x128xf32> -> vector<8x128xf32>
    %35 = vector.broadcast %33 : vector<8x1xf32> to vector<8x128xf32>
    %36 = arith.addf %34, %35 : vector<8x128xf32>
    %cst_33 = arith.constant 0.000000e+00 : f32
    %37 = vector.broadcast %cst_33 : f32 to vector<8x128xf32>
    %38 = arith.maximumf %36, %37 : vector<8x128xf32>
    %cst_34 = arith.constant 0.000000e+00 : f32
    %39 = vector.broadcast %cst_34 : f32 to vector<8x128xf32>
    %40 = arith.select %9, %38, %39 : vector<8x128xi1>, vector<8x128xf32>
    %c0_35 = arith.constant 0 : index
    %c4_36 = arith.constant 4 : index
    %41 = vector.load %arg5[%c0_35, %c4_36] : memref<8x256xf32, #tpu.memory_space<vmem>>, vector<8x128xf32>
    tpu.vector_store %arg5[%c0_35, %c4_36], %40 {strides = array<i32>} : memref<8x256xf32, #tpu.memory_space<vmem>>, vector<8x128xf32>,
    %c0_37 = arith.constant 0 : index
    %c0_38 = arith.constant 0 : index
    %42 = vector.load %arg5[%c0_37, %c0_38] : memref<8x256xf32, #tpu.memory_space<vmem>>, vector<8x128xf32>
    %c0_39 = arith.constant 0 : index
    %c4_40 = arith.constant 4 : index
    %43 = vector.load %arg5[%c0_39, %c4_40] : memref<8x256xf32, #tpu.memory_space<vmem>>, vector<8x128xf32>
    %c0_41 = arith.constant 0 : index
    %c8 = arith.constant 8 : index
    %44 = vector.load %arg5[%c0_41, %c8] : memref<8x256xf32, #tpu.memory_space<vmem>>, vector<8x128xf32>
    %45 = tpu.concatenate %42, %43, %44 in 0 : vector<8x128xf32>, vector<8x128xf32>, vector<8x128xf32> -> vector<24x128xf32>
    %c2_42 = arith.constant 2 : index
    %c0_43 = arith.constant 0 : index
    %c0_44 = arith.constant 0 : index
    %46 = vector.load %arg2[%c2_42, %c0_43, %c0_44] : memref<3x8x24xf32, #tpu.memory_space<vmem>>, vector<1x8x24xf32>
    %47 = vector.shape_cast %46 : vector<1x8x24xf32> to vector<8x24xf32>
    %c2_45 = arith.constant 2 : index
    %c0_46 = arith.constant 0 : index
    %c0_47 = arith.constant 0 : index
    %48 = vector.load %arg3[%c2_45, %c0_46, %c0_47] : memref<3x8x1xf32, #tpu.memory_space<vmem>>, vector<1x8x1xf32>
    %49 = vector.shape_cast %48 : vector<1x8x1xf32> to vector<8x1xf32>
    %cst_48 = arith.constant dense<0.000000e+00> : vector<8x128xf32>
    %50 = tpu.matmul %47, %45, %cst_48 {dimension_numbers = #tpu.dot_dimension_numbers<[1], [0], [0], [1], [0, 0, 1, 1], [], []>} : vector<8x24xf32>, vector<24x128xf32>, vector<8x128xf32> -> vector<8x128xf32>
    %51 = vector.broadcast %49 : vector<8x1xf32> to vector<8x128xf32>
    %52 = arith.addf %50, %51 : vector<8x128xf32>
    %cst_49 = arith.constant 0.000000e+00 : f32
    %53 = vector.broadcast %cst_49 : f32 to vector<8x128xf32>
    %54 = arith.maximumf %52, %53 : vector<8x128xf32>
    %cst_50 = arith.constant 0.000000e+00 : f32
    %55 = vector.broadcast %cst_50 : f32 to vector<8x128xf32>
    %56 = arith.select %9, %54, %55 : vector<8x128xi1>, vector<8x128xf32>
    %c0_51 = arith.constant 0 : index
    %c0_52 = arith.constant 0 : index
    %c0_53 = arith.constant 0 : index
    %57 = vector.load %arg4[%c0_51, %c0_52, %c0_53] : memref<1x8x128xf32, #tpu.memory_space<vmem>>, vector<1x8x128xf32>
    %58 = vector.shape_cast %57 : vector<1x8x128xf32> to vector<8x128xf32>
    %59 = vector.shape_cast %56 : vector<8x128xf32> to vector<1x8x128xf32>
    tpu.vector_store %arg4[%c0_51, %c0_52, %c0_53], %59 {strides = array<i32>} : memref<1x8x128xf32, #tpu.memory_space<vmem>>, vector<1x8x128xf32>,
    return
  }
  func.func @transform_0(%arg0: i32) -> (i32, i32, i32) {
    %c0_i32 = arith.constant 0 : i32
    %c0_i32_0 = arith.constant 0 : i32
    %c0_i32_1 = arith.constant 0 : i32
    return %arg0, %c0_i32, %c0_i32_0 : i32, i32, i32
  }
  func.func @transform_1(%arg0: i32) -> (i32, i32, i32) {
    %c0_i32 = arith.constant 0 : i32
    %c0_i32_0 = arith.constant 0 : i32
    %c0_i32_1 = arith.constant 0 : i32
    %c0_i32_2 = arith.constant 0 : i32
    return %c0_i32, %c0_i32_0, %c0_i32_1 : i32, i32, i32
  }
  func.func @transform_2(%arg0: i32) -> (i32, i32, i32) {
    %c0_i32 = arith.constant 0 : i32
    %c0_i32_0 = arith.constant 0 : i32
    %c0_i32_1 = arith.constant 0 : i32
    %c0_i32_2 = arith.constant 0 : i32
    return %c0_i32, %c0_i32_0, %c0_i32_1 : i32, i32, i32
  }
  func.func @transform_3(%arg0: i32) -> (i32, i32, i32) {
    %c0_i32 = arith.constant 0 : i32
    %c0_i32_0 = arith.constant 0 : i32
    %c0_i32_1 = arith.constant 0 : i32
    return %arg0, %c0_i32, %c0_i32_0 : i32, i32, i32
  }
}

</mosaic_0001>

<bundles_post_ra>
// kernel: tpu_custom_call.1
= control target key start
LH: loop header
LB: loop body
LE: loop exit
PB: predicated region body
PF: predicated region fallthrough
CT: control target
= control target key end

     0   :  { %8 = vsyncpa [#allocation5], 0  ;;  %s1148_s0 = inlined_call_operand.hbm [shape: f32[2,8,16], index: 0, kind: input, shape index: {}]   ;;  %s1149_s1 = inlined_call_operand.vmem [shape: f32[3,8,24], index: 1, kind: input, shape index: {}]   ;;  %s1150_s2 = inlined_call_operand.vmem [shape: f32[3,8,1], index: 2, kind: input, shape index: {}]   ;;  %s1151_s3 = inlined_call_operand.hbm [shape: f32[2,8,128], index: 3, kind: output, shape index: {}]  }
   0x1   :  { %10 = vsyncpa [#allocation5 + $0x1], 0 }
   0x2   :  { %11 = vsyncpa [#allocation6], 0 }
   0x3   :  { %13 = vsyncpa [#allocation6 + $0x1], 0  ;;  %s916_s12 = smov 0   ;;  %s918_s13 = smov 0  }
   0x4   :  { %s920_s14 = smov 0   ;;  %s922_s15 = smov 0  }
   0x5 LB: > { %s937_s16 = sadd.s32 4294967295, %s882_s15   ;;  %s631_s17 = sadd.s32 4294967294, %s882_s15   ;;  %s882_s15 = sphi %s922_s15, %s1166_s15   ;;  %s878_s14 = sphi %s920_s14, %s1165_s14   ;;  %s874_s13 = sphi %s918_s13, %s1164_s13   ;;  %s870_s12 = sphi %s916_s12, %s1163_s12  }
   0x6   : > { %s941_s18 = sadd.s32 1, %s882_s15   ;;  %s26_s19 = sadd.s32 1, %s878_s14 }
   0x7   : > { %s23_s20 = ssub.s32 %s882_s15, %s941_s18  ;;  %p33_p0 = scmp.ne.s32.totalorder %s878_s14, %s874_s13 }
   0x8   : > { %p24_p1 = scmp.eq.s32.totalorder %s23_s20, 0  ;;  %p34_p2 = scmp.eq.s32.totalorder %s882_s15, 0 }
   0x9   : > { %p39_p3 = scmp.ne.s32.totalorder %s874_s13, %s870_s12  ;;  %p40_p4 = scmp.eq.s32.totalorder %s937_s16, 0 }
   0xa   : > { %s953_s21 = scalar_select %p24_p1, %s878_s14, %s26_s19  }
   0xb   : > { %p955_p5 = por %p34_p2, %p33_p0  ;;  %p959_p6 = por %p40_p4, %p39_p3 }
   0xc   : > { %p105_p7 = scmp.eq.s32.totalorder %s937_s16, 1  ;;  %p111_p8 = scmp.eq.s32.totalorder %s631_s17, 1 }
   0xd   : > { %p710_p10 = scmp.lt.s32.totalorder %s882_s15, 2  ;;  %s137_s26 = sand.u32 1, %s878_s14  }
   0xe   : > { %p966_p11 = por %p105_p7, %p33_p0  ;;  %p970_p12 = por %p111_p8, %p39_p3 }
   0xf   : > { %s635_s27 = sshll.u32 %s882_s15, 7  ;;  %s634_s28 = sshll.u32 %s137_s26, 3 }
  0x10   : > { %s1155_s24 = scalar_select %p966_p11, 1, 0 }
  0x11   : > { %s1156_s25 = scalar_select %p970_p12, 1, 0 }
  0x12   : > { %s979_s4 = scalar_lea.hbm %s1148_s0, %s635_s27  ;;  %s141_s5 = scalar_lea.vmem [#allocation4], %s634_s28 }
  0x13   : > { %s148_s6 = sshll.u32 %s141_s5, 4  ;;  %p983_p13 = pnand %p710_p10, %p955_p5  ;;  %s987_s6 = int_to_ptr.vmem [resolvable:$true] %s148_s6 }
  0x14   : > { %s138_s8 = scalar_lea.sflag [#allocation5], %s137_s26  ;;  %s786_s9 = scalar_lea.hbm %s979_s4, 128 }
  0x15   : > { %p787_p2 = scmp.ne.s32.totalorder %s979_s4, %s786_s9  ;;  %p788_p3 = pneg %p983_p13 }
  0x16   : > { %s791_s17 = scalar_lea.hbm %s1148_s0, 256  ;;  %p792_p5 = scmp.lt.u32.totalorder %s979_s4, %s1148_s0 }
  0x17   : > { %p789_p4 = pnand %p788_p3, %p787_p2  ;;  %p793_p8 = scmp.lt.u32.totalorder %s791_s17, %s786_s9 }
  0x18   : > { %p795_p9 = scmp.lt.u32.totalorder %s786_s9, %s979_s4 }
  0x19   : > { %p790_p7 = pneg %p789_p4  ;;  %p794_p10 = por %p793_p8, %p792_p5 }
  0x1b   : > { %p796_p0 = por %p795_p9, %p794_p10 }
  0x1d   : > { %p797_p1 = pnand %p796_p0, %p790_p7 }
  0x1f   : > { %800 = shalt.err (!%p797_p1)
}
  0x20   : > { %s801_s22 = scalar_lea.vmem %s987_s6, 128  ;;  %s884_s26 = smov [#allocation4]  }
  0x21   : > { %p802_p2 = scmp.ne.s32.totalorder %s987_s6, %s801_s22  ;;  %s806_s27 = sshll.u32 %s884_s26, 4  ;;  %s807_s27 = int_to_ptr.vmem [resolvable:$false] %s806_s27 }
  0x22   : > { %s808_s28 = scalar_lea.vmem %s807_s27, 256  ;;  %p809_p11 = scmp.lt.s32.totalorder %s987_s6, %s807_s27 }
  0x23   : > { %p804_p4 = pnand %p802_p2, %p788_p3  ;;  %p810_p5 = scmp.lt.s32.totalorder %s808_s28, %s801_s22 }
  0x25   : > { %p805_p12 = pneg %p804_p4  ;;  %p811_p8 = por %p810_p5, %p809_p11 }
  0x27   : > { %p812_p9 = pnand %p811_p8, %p805_p12 }
  0x29   : > { %815 = shalt.err (!%p812_p9)
}
  0x2a   : > { %705 = dma.hbm_to_vmem [thread:$0]  (!%p983_p13), %s979_s4, 128, %s987_s6, %s138_s8  }
  0x2b   : > { %p1158_p0 = scmp.lt.s32.totalorder %s882_s15, 3  ;;  %p1159_p1 = scmp.ge.s32.totalorder %s882_s15, 1 }
  0x2d   : > { %p154_p3 = pnand %p1159_p1, %p1158_p0 }
  0x2e   : > { %s1021_s29 = sand.u32 (!%p154_p3), 1, %s874_s13  }
  0x2f   : > { %157 = sbr.rel (%p154_p3) target bundleno = 1713 (0x6b1), region = 32  ;;  %s637_s30 = sshll.u32 (!%p154_p3), %s1021_s29, 3 }
  0x30   : > { %s160_s5 = scalar_lea.sflag (!%p154_p3), [#allocation5], %s1021_s29  ;;  %s163_s7 = scalar_lea.vmem (!%p154_p3), [#allocation4], %s637_s30 }
  0x36   : > { %861 = dma.done.wait (%p959_p6), %s160_s5, 128  }
  0x37   : > { %863 = vsyncadd (%p959_p6), %s160_s5, 4294967168  ;;  %v885_v0 = vmov 0.0   ;;  %v190_v1 = vld [vmem:[%s163_s7] sm:$0xff]  ;;  %s886_s4 = smov 4   ;;  %vm195_vm0 = vcmask 162848   ;;  %s887_s6 = smov 126   ;;  %v197_v29 = vlaneseq }
  0x38   : > { %186 = vst [vmem:[#allocation2] sm:$0xff] %v885_v0  ;;  %187 = vst [vmem:[#allocation2 + $0x8] sm:$0xff] %v885_v0  ;;  %192 = vrot.lane.b32.xlu0 %v190_v1, %s886_s4  ;;  %s888_s23 = smov 127   ;;  %s889_s8 = smov 125   ;;  %v890_v5 = vmov 0.0|0.0   ;;  %vm208_vm1 = vcmask 1039360  }
  0x39   : > { %188 = vst [vmem:[#allocation3] sm:$0xff] %v885_v0  ;;  %189 = vst [vmem:[#allocation3 + $0x8] sm:$0xff] %v885_v0  ;;  %689 = vmatprep.subr.bf16.mxu0 %v890_v5  ;;  %692 = vmatprep.subr.bf16.mxu1 %v890_v5  ;;  %vm214_vm2 = vcmask 1031168   ;;  %vm891_vm3 = vmmov 0   ;;  %v892_v14 = vmov 0   ;;  %v217_v15 = vld [vmem:[%s1150_s2] sm:$0xff] }
  0x3a   : > { %668 = vmatprep.mubr.msk.f32.mxu0 %vm891_vm3, %v885_v0  ;;  %677 = vmatprep.mubr.msk.f32.mxu1 %vm891_vm3, %v885_v0  ;;  %vm235_vm4 = vcmask 1022976   ;;  %v216_v27 = vld [vmem:[%s1149_s1] sm:$0xff]  ;;  %vm242_vm5 = vcmask 195584   ;;  %v1055_v31 = vand.u32 127, %v197_v29  ;;  %vm322_vm7 = vcmask 1047584   ;;  %s893_s19 = smov 124  }
  0x3b   : > { %780 = vset.pattern.permute.xlu1 %v892_v14  ;;  %769 = vset.pattern.permute.xlu0 %v892_v14  ;;  %vm324_vm8 = vcmask 31744   ;;  %vm339_vm9 = vcmask 1014784   ;;  %v641_v49 = vld [vmem:[%s1150_s2 + $0x8] sm:$0xff]  ;;  %s894_s28 = smov 120   ;;  %vm459_vm10 = vcmask 982016   ;;  %v643_v14 = vld [vmem:[%s1149_s1 + $0x10] sm:$0xff] }
  0x3c   : > { %vm199_vm6 = vcmp.lt.s32.totalorder %v1055_v31, 16  ;;  %v640_v57 = vld [vmem:[%s1149_s1 + $0x8] sm:$0xff]  ;;  %p1160_p11 = scmp.ne.s32.totalorder %s1155_s24, 0 }
  0xaa   : > { %v193_v2 = vpop.permute.xlu0 %192 }
  0xab   : > { %196 = vst.msk [vmem:[#allocation2] sm:$0xff] %vm195_vm0, %v193_v2 }
  0xb2   : > { %v200_v3 = vld [vmem:[#allocation2] sm:$0xff] }
  0xb3   : > { %210 = vrot.lane.b32.xlu1 %v200_v3, %s887_s6  ;;  %v754_v4 = vpack.i.bf16 %v885_v0, %v200_v3 }
  0xb5   : > { %755 = vrot.lane.b32.xlu0 %v754_v4, %s888_s23  ;;  %s647_s23 = sshll.u32 %s937_s16, 7 }
  0xb6   : > { %s1102_s17 = scalar_lea.hbm %s1151_s3, %s647_s23 }
  0xb7   : > { %212 = vrot.lane.b32.xlu1 %v885_v0, %s887_s6 }
  0xb9   : > { %760 = vrot.lane.b32.xlu0 %v754_v4, %s889_s8 }
 0x125   : > { %v211_v6 = vpop.permute.xlu1 %210 }
 0x127   : > { %v756_v7 = vpop.permute.xlu0 %755 }
 0x128   : > { %v758_v8 = vunpack.i.h.bf16 %v756_v7  ;;  %v757_v9 = vunpack.i.l.bf16 %v756_v7 }
 0x129   : > { %v213_v10 = vpop.permute.xlu1 %212 }
 0x12a   : > { %v209_v11 = vsel %vm208_vm1, %v757_v9, %v758_v8  ;;  %v215_v12 = vsel %vm214_vm2, %v211_v6, %v213_v10  ;;  %v644_v6 = vld [vmem:[%s1150_s2 + $0x10] sm:$0xff] }
 0x12b   : > { %v764_v13 = vpack.i.bf16 %v758_v8, %v209_v11  ;;  %231 = vrot.lane.b32.xlu0 %v215_v12, %s889_s8  ;;  %v761_v16 = vpop.permute.xlu0 %760 }
 0x12c   : > { %v763_v17 = vunpack.i.h.bf16 %v761_v16  ;;  %v762_v18 = vunpack.i.l.bf16 %v761_v16 }
 0x12d   : > { %765 = vrot.lane.b32.xlu1 %v764_v13, %s889_s8 }
 0x12e   : > { %v236_v22 = vsel %vm235_vm4, %v762_v18, %v763_v17 }
 0x12f   : > { %220 = vperm.xlu0 %769, %v217_v15  }
 0x131   : > { %233 = vrot.lane.b32.xlu1 %v213_v10, %s889_s8  ;;  %s185_s8 = scalar_lea.vmem [#allocation7], %s637_s30  ;;  %s895_s30 = smov [#allocation7]  }
 0x132   : > { %s561_s9 = sshll.u32 %s185_s8, 4  ;;  %s820_s20 = sshll.u32 %s895_s30, 4  ;;  %s1104_s9 = int_to_ptr.vmem [resolvable:$true] %s561_s9  ;;  %s821_s20 = int_to_ptr.vmem [resolvable:$false] %s820_s20 }
 0x133   : > { %s816_s16 = scalar_lea.vmem %s1104_s9, 128  ;;  %s822_s22 = scalar_lea.vmem %s821_s20, 256 }
 0x134   : > { %p817_p6 = scmp.ne.s32.totalorder %s1104_s9, %s816_s16  ;;  %p823_p7 = scmp.lt.s32.totalorder %s1104_s9, %s821_s20 }
 0x135   : > { %p824_p10 = scmp.lt.s32.totalorder %s822_s22, %s816_s16 }
 0x136   : > { %p818_p12 = pnand %p817_p6, %p1160_p11 }
 0x137   : > { %p825_p2 = por %p824_p10, %p823_p7 }
 0x138   : > { %p819_p13 = pneg %p818_p12 }
 0x13a   : > { %p826_p4 = pnand %p825_p2, %p819_p13 }
 0x19d   : > { %v232_v26 = vpop.permute.xlu0 %231 }
 0x19f   : > { %v766_v19 = vpop.permute.xlu1 %765 }
 0x1a0   : > { %v768_v20 = vunpack.i.h.bf16 %v766_v19  ;;  %v767_v21 = vunpack.i.l.bf16 %v766_v19 }
 0x1a2   : > { %v237_v23 = vsel %vm235_vm4, %v767_v21, %v768_v20 }
 0x1a3   : > { %v690_v24 = vpack.c.bf16 %v237_v23, %v236_v22  ;;  %v234_v25 = vpop.permute.xlu1 %233 }
 0x1a4   : > { %v238_v28 = vsel %vm235_vm4, %v232_v26, %v234_v25 }
 0x1a5   : > { %691 = vmatpush3.bf16.msra.mxu0 %v690_v24 }
 0x1a6   : > { %666 = vmatprep.subr.mxu0 %v885_v0 }
 0x1a9   : > { %667 = vmatpush3.msra.mxu0 %v238_v28 }
 0x1aa   : > { %669 = vmatmul.mubr.msk.f32.vlgmr.msra.gmra.mrb[0].mxu0 %vm242_vm5, %v216_v27  ;;  %695 = vmatprep.subr.bf16.mxu0 %v890_v5 }
 0x1ab   : > { %686 = vmatprep.mubr.msk.f32.mxu0 %vm891_vm3, %v885_v0 }
 0x1ae   : > { %v221_v30 = vpop.permute.xlu0 %220 }
 0x27d   : > { %v312_v32 = vpop.f32.mrb[0].mxu0 }
 0x27e   : > { %v313_v33 = vadd.f32 %v312_v32, %v221_v30  ;;  %v670_v34 = vpop.f32.mrb[1].mxu0 }
 0x280   : > { %v316_v35 = vmax.f32 %v313_v33, 0.0 }
 0x282   : > { %v317_v36 = vsel %vm199_vm6, %v316_v35, 0.0 }
 0x283   : > { %319 = vrot.lane.b32.xlu1 %v317_v36, %s886_s4 }
 0x2f5   : > { %v320_v37 = vpop.permute.xlu1 %319 }
 0x2f6   : > { %323 = vst.msk [vmem:[#allocation3] sm:$0xff] %vm322_vm7, %v320_v37 }
 0x2f7   : > { %325 = vst.msk [vmem:[#allocation3 + $0x8] sm:$0xff] %vm324_vm8, %v320_v37 }
 0x2fd   : > { %v326_v38 = vld [vmem:[#allocation3] sm:$0xff] }
 0x2fe   : > { %v327_v39 = vld [vmem:[#allocation3 + $0x8] sm:$0xff]  ;;  %335 = vrot.lane.b32.xlu0 %v326_v38, %s893_s19 }
 0x2ff   : > { %v770_v40 = vpack.i.bf16 %v327_v39, %v326_v38 }
 0x301   : > { %771 = vrot.lane.b32.xlu1 %v770_v40, %s887_s6 }
 0x305   : > { %337 = vrot.lane.b32.xlu1 %v327_v39, %s893_s19 }
 0x370   : > { %v336_v45 = vpop.permute.xlu0 %335 }
 0x373   : > { %v772_v41 = vpop.permute.xlu1 %771 }
 0x374   : > { %v774_v42 = vunpack.i.h.bf16 %v772_v41  ;;  %v773_v43 = vunpack.i.l.bf16 %v772_v41 }
 0x376   : > { %v334_v44 = vsel %vm214_vm2, %v773_v43, %v774_v42 }
 0x377   : > { %v775_v46 = vpack.i.bf16 %v774_v42, %v334_v44  ;;  %v338_v47 = vpop.permute.xlu1 %337 }
 0x378   : > { %v340_v48 = vsel %vm339_vm9, %v336_v45, %v338_v47 }
 0x379   : > { %354 = vrot.lane.b32.xlu1 %v340_v48, %s887_s6  ;;  %776 = vrot.lane.b32.xlu0 %v775_v46, %s887_s6 }
 0x37d   : > { %356 = vrot.lane.b32.xlu0 %v338_v47, %s887_s6  ;;  %347 = vperm.xlu1 %780, %v641_v49  }
 0x3eb   : > { %v777_v50 = vpop.permute.xlu0 %776  ;;  %v355_v56 = vpop.permute.xlu1 %354 }
 0x3ec   : > { %v779_v51 = vunpack.i.h.bf16 %v777_v50  ;;  %v778_v52 = vunpack.i.l.bf16 %v777_v50 }
 0x3ee   : > { %v358_v53 = vsel %vm214_vm2, %v778_v52, %v779_v51 }
 0x3ef   : > { %v693_v54 = vpack.c.bf16 %v358_v53, %v334_v44  ;;  %v357_v55 = vpop.permute.xlu0 %356 }
 0x3f0   : > { %v359_v58 = vsel %vm214_vm2, %v355_v56, %v357_v55 }
 0x3f1   : > { %694 = vmatpush3.bf16.msra.mxu1 %v693_v54 }
 0x3f2   : > { %675 = vmatprep.subr.mxu1 %v885_v0 }
 0x3f5   : > { %676 = vmatpush3.msra.mxu1 %v359_v58 }
 0x3f6   : > { %678 = vmatmul.mubr.msk.f32.vlgmr.msra.gmra.mrb[0].mxu1 %vm242_vm5, %v640_v57 }
 0x3fc   : > { %v348_v59 = vpop.permute.xlu1 %347 }
 0x4c9   : > { %v432_v60 = vpop.f32.mrb[0].mxu1 }
 0x4ca   : > { %v433_v61 = vadd.f32 %v432_v60, %v348_v59  ;;  %v679_v62 = vpop.f32.mrb[1].mxu1 }
 0x4cc   : > { %v436_v63 = vmax.f32 %v433_v61, 0.0 }
 0x4ce   : > { %v437_v1 = vsel %vm199_vm6, %v436_v63, 0.0 }
 0x4cf   : > { %439 = vrot.lane.b32.xlu0 %v437_v1, %s886_s4 }
 0x541   : > { %v440_v2 = vpop.permute.xlu0 %439 }
 0x542   : > { %442 = vst.msk [vmem:[#allocation2] sm:$0xff] %vm322_vm7, %v440_v2 }
 0x543   : > { %443 = vst.msk [vmem:[#allocation2 + $0x8] sm:$0xff] %vm324_vm8, %v440_v2 }
 0x549   : > { %v445_v3 = vld [vmem:[#allocation2] sm:$0xff] }
 0x54a   : > { %v446_v4 = vld [vmem:[#allocation2 + $0x8] sm:$0xff]  ;;  %455 = vrot.lane.b32.xlu0 %v445_v3, %s894_s28 }
 0x54b   : > { %v781_v5 = vpack.i.bf16 %v446_v4, %v445_v3 }
 0x54d   : > { %782 = vrot.lane.b32.xlu1 %v781_v5, %s893_s19  ;;  %s548_s19 = scalar_lea.sflag [#allocation6], %s1021_s29 }
 0x54e   : > { %468 = vperm.xlu0 %769, %v644_v6  }
 0x551   : > { %457 = vrot.lane.b32.xlu1 %v446_v4, %s894_s28 }
 0x5bc   : > { %v456_v13 = vpop.permute.xlu0 %455 }
 0x5bf   : > { %v783_v7 = vpop.permute.xlu1 %782 }
 0x5c0   : > { %v785_v8 = vunpack.i.h.bf16 %v783_v7  ;;  %v784_v9 = vunpack.i.l.bf16 %v783_v7 }
 0x5c2   : > { %v453_v10 = vsel %vm339_vm9, %v784_v9, %v785_v8 }
 0x5c3   : > { %v696_v11 = vpack.c.bf16 %v453_v10, %v445_v3  ;;  %v458_v12 = vpop.permute.xlu1 %457 }
 0x5c4   : > { %v460_v15 = vsel %vm459_vm10, %v456_v13, %v458_v12 }
 0x5c5   : > { %697 = vmatpush3.bf16.msra.mxu0 %v696_v11 }
 0x5c6   : > { %684 = vmatprep.subr.mxu0 %v885_v0 }
 0x5c9   : > { %685 = vmatpush3.msra.mxu0 %v460_v15 }
 0x5ca   : > { %687 = vmatmul.mubr.msk.f32.vlgmr.msra.gmra.mrb[2].mxu0 %vm242_vm5, %v643_v14 }
 0x5cd   : > { %v469_v16 = vpop.permute.xlu0 %468 }
 0x69d   : > { %v540_v17 = vpop.f32.mrb[2].mxu0 }
 0x69e   : > { %v541_v18 = vadd.f32 %v540_v17, %v469_v16  ;;  %v688_v19 = vpop.f32.mrb[3].mxu0 }
 0x6a0   : > { %v544_v0 = vmax.f32 %v541_v18, 0.0 }
 0x6a2   : > { %v545_v20 = vsel %vm199_vm6, %v544_v0, 0.0 }
 0x6a3   : > { %546 = vst [vmem:[%s185_s8] sm:$0xff] %v545_v20 }
 0x6a4   : > { %829 = shalt.err (!%p826_p4)
}
 0x6a5   : > { %s830_s29 = scalar_lea.hbm %s1102_s17, 128  ;;  %s834_s28 = scalar_lea.hbm %s1151_s3, 256 }
 0x6a6   : > { %p831_p5 = scmp.ne.s32.totalorder %s1102_s17, %s830_s29  ;;  %p835_p0 = scmp.lt.u32.totalorder %s1102_s17, %s1151_s3 }
 0x6a7   : > { %p836_p1 = scmp.lt.u32.totalorder %s834_s28, %s830_s29  ;;  %p838_p6 = scmp.lt.u32.totalorder %s830_s29, %s1102_s17 }
 0x6a8   : > { %p832_p8 = pnand %p831_p5, %p1160_p11 }
 0x6a9   : > { %p837_p3 = por %p836_p1, %p835_p0 }
 0x6aa   : > { %p833_p9 = pneg %p832_p8 }
 0x6ab   : > { %p839_p12 = por %p838_p6, %p837_p3 }
 0x6ad   : > { %p840_p13 = pnand %p839_p12, %p833_p9 }
 0x6af   : > { %843 = shalt.err (!%p840_p13)
}
 0x6b0   : > { %700 = dma.vmem_to_hbm [thread:$0]  (%p1160_p11), %s1104_s9, 128, %s1102_s17, %s548_s19  }
 0x6b1 PF: > { %s573_s4 = sand.u32 1, %s870_s12   ;;  %p1161_p7 = scmp.ne.s32.totalorder %s1156_s25, 0 }
 0x6b2   : > { %p1162_p10 = scmp.ge.s32.totalorder %s882_s15, 2  ;;  %s574_s6 = scalar_lea.sflag [#allocation6], %s573_s4 }
 0x6b4   : > { %p707_p2 = pnand %p1162_p10, %p1161_p7 }
 0x6b6   : > { %865 = dma.done.wait (!%p707_p2), %s574_s6, 128  }
 0x6b7   : > { %867 = vsyncadd (!%p707_p2), %s574_s6, 4294967168  ;;  %p16_p4 = scmp.ge.s32.totalorder %s941_s18, 4   ;;  %s1163_s12 = smov %s874_s13 }
 0x6b8   : > { %s1164_s13 = smov %s878_s14  ;;  %s1165_s14 = smov %s953_s21 }
 0x6b9   : > { %s1166_s15 = smov %s941_s18  ;;  %18 = sbr.rel (!%p16_p4) target bundleno = 5 (0x5), region = 81 }
 0x6c0   :  { %579 = vsyncpa [#allocation5], 1 }
 0x6c1   :  { %581 = vsyncpa [#allocation5 + $0x1], 1 }
 0x6c2   :  { %582 = vsyncpa [#allocation6], 1 }
 0x6c3   :  { %584 = vsyncpa [#allocation6 + $0x1], 1 }

</bundles_post_ra>
